<compile_context>
chip_gen: v7x
topology: tpu7x:2x2x1
jax: 0.10.0
libtpu: 0.0.40
codegen_flags: <defaults>
</compile_context>

<pallas_src>
import jax
import jax.numpy as jnp
from jax import lax
from jax.experimental import pallas as pl
from jax.experimental.pallas import tpu as pltpu


def _make_fused_basic_kernel(N, Cp, H, W):
    """Kernel body for the whole batch; working layout is (Cp, N*H*W)."""
    P = H * W
    NP = N * P
    taps = [(ky - 1, kx - 1) for ky in range(3) for kx in range(3)]

    def kernel(x_ref, w1_ref, b1_ref, w2_ref, b2_ref, mask_ref,
               o_ref, xflat_ref, col_ref):
        # Flatten the batch onto the lane axis: xflat[c, n*P + p] = x[n, c, p].
        # (x was already zero-padded to Cp channels in the wrapper, so these
        #  are full-sublane stores and the residual padding rows are zero.)
        for n in range(N):
            xflat_ref[:, n * P:(n + 1) * P] = x_ref[n]
        xres = xflat_ref[...]                                    # (Cp, NP) f32

        def conv_bn_relu(src, w_ref, b_ref):
            # im2col: 9 lane-rolled (XLU), boundary-masked copies of `src`,
            # stored as bf16 into the (9*Cp, NP) VMEM slab.  Tap stores start
            # at sublane multiples of Cp (Cp % 8 == 0) -> unmasked stores.
            for t, (dy, dx) in enumerate(taps):
                d = dy * W + dx
                if d == 0:
                    tap = src                                    # center tap
                else:
                    tap = (pltpu.roll(src, shift=(-d) % NP, axis=1)
                           * mask_ref[t:t + 1, :])               # (1,NP) bcast
                col_ref[t * Cp:(t + 1) * Cp, :] = tap.astype(jnp.bfloat16)
            # One bf16 MXU matmul per conv, f32 accumulation:
            #   (Cp, 9*Cp) @ (9*Cp, N*P) -> (Cp, N*P)
            y = jnp.dot(w_ref[...], col_ref[...],
                        preferred_element_type=jnp.float32)
            # BN scale is already folded into w; add shift + ReLU (f32 VPU).
            return jnp.maximum(y + b_ref[...], 0.0)

        h1 = conv_bn_relu(xres, w1_ref, b1_ref)                  # conv1+bn1+relu
        h2 = conv_bn_relu(h1, w2_ref, b2_ref)                    # conv2+bn2+relu
        out = jnp.maximum(h2 + xres, 0.0)                        # +residual, relu
        for n in range(N):
            o_ref[n] = out[:, n * P:(n + 1) * P].astype(o_ref.dtype)

    return kernel


def _tap_masks(H, W):
    """(9, H*W) 0/1 masks: 1 where the 3x3 tap reads inside the image."""
    h = jnp.arange(H)[:, None]
    w = jnp.arange(W)[None, :]
    rows = []
    for ky in range(3):
        for kx in range(3):
            dy, dx = ky - 1, kx - 1
            valid = ((h + dy >= 0) & (h + dy < H) &
                     (w + dx >= 0) & (w + dx < W))
            rows.append(valid.reshape(-1))
    return jnp.stack(rows).astype(jnp.float32)


def bn_fold(gamma, beta, running_mean, running_var, eps=1e-5):
    """Fold eval-mode BatchNorm into a per-channel scale/shift."""
    inv_std = 1.0 / jnp.sqrt(running_var + eps)
    scale = gamma * inv_std
    shift = beta - running_mean * scale
    return scale, shift


@jax.jit
def basic_block_forward(x_nchw, params):
    """Pallas implementation of Basic.forward (stride=1, downsample=None)."""
    N, C, H, W = x_nchw.shape
    P = H * W
    Cp = -(-C // 8) * 8                      # channels padded to sublane multiple
    assert params["conv1_w"].shape == (C, C, 3, 3)   # inplanes == planes

    # Zero-pad channels wrapper-side (no-op when C is already a multiple of 8).
    xp = x_nchw
    if Cp != C:
        xp = jnp.pad(x_nchw, ((0, 0), (0, Cp - C), (0, 0), (0, 0)))
    xp = xp.reshape(N, Cp, P)                # free reshape, stays NCHW order

    s1, b1 = bn_fold(params["bn1_gamma"], params["bn1_beta"],
                     params["bn1_mean"], params["bn1_var"])
    s2, b2 = bn_fold(params["bn2_gamma"], params["bn2_beta"],
                     params["bn2_mean"], params["bn2_var"])

    def prep_w(w_oihw, scale):
        # (O, I, 3, 3) -> (O, 9, I) with K ordered (tap, ci) to match im2col,
        # fold BN scale into the output channels, zero-pad O/I to Cp, -> bf16.
        o, i = w_oihw.shape[0], w_oihw.shape[1]
        w = jnp.transpose(w_oihw, (0, 2, 3, 1)).reshape(o, 9, i)
        w = w * scale[:, None, None]
        w = jnp.pad(w, ((0, Cp - o), (0, 0), (0, Cp - i)))
        return w.reshape(Cp, 9 * Cp).astype(jnp.bfloat16)

    w1 = prep_w(params["conv1_w"], s1)
    w2 = prep_w(params["conv2_w"], s2)
    b1p = jnp.pad(b1, (0, Cp - C)).reshape(Cp, 1).astype(jnp.float32)
    b2p = jnp.pad(b2, (0, Cp - C)).reshape(Cp, 1).astype(jnp.float32)
    masks = jnp.tile(_tap_masks(H, W), (1, N))        # (9, N*P), image-periodic

    def full(shape):
        return pl.BlockSpec(shape, lambda i: (0,) * len(shape))

    out = pl.pallas_call(
        _make_fused_basic_kernel(N, Cp, H, W),
        out_shape=jax.ShapeDtypeStruct((N, Cp, P), x_nchw.dtype),
        grid=(1,),                                   # whole batch, one step
        in_specs=[
            full((N, Cp, P)),                        # x (and residual)
            full((Cp, 9 * Cp)), full((Cp, 1)),       # w1 (bf16, scale-folded), bn1 shift
            full((Cp, 9 * Cp)), full((Cp, 1)),       # w2 (bf16, scale-folded), bn2 shift
            full((9, N * P)),                        # boundary masks
        ],
        out_specs=full((N, Cp, P)),
        scratch_shapes=[
            pltpu.VMEM((Cp, N * P), jnp.float32),    # batch-flat x (residual)
            pltpu.VMEM((9 * Cp, N * P), jnp.bfloat16),  # im2col slab
        ],
    )(xp, w1, b1p, w2, b2p, masks)

    return out.reshape(N, Cp, H, W)[:, :C]


def _reference_forward(x_nchw, params):
    """Pure-JAX f32 reference (lax.conv) of the same Basic block."""
    def conv(x, w):  # NCHW, OIHW
        return lax.conv_general_dilated(
            x, w, window_strides=(1, 1), padding=((1, 1), (1, 1)),
            dimension_numbers=("NCHW", "OIHW", "NCHW"))

    def bn(x, g, b, m, v, eps=1e-5):
        g, b, m, v = (t.reshape(1, -1, 1, 1) for t in (g, b, m, v))
        return (x - m) / jnp.sqrt(v + eps) * g + b

    residual = x_nchw
    out = conv(x_nchw, params["conv1_w"])
    out = bn(out, params["bn1_gamma"], params["bn1_beta"],
             params["bn1_mean"], params["bn1_var"])
    out = jnp.maximum(out, 0.0)
    out = conv(out, params["conv2_w"])
    out = bn(out, params["bn2_gamma"], params["bn2_beta"],
             params["bn2_mean"], params["bn2_var"])
    out = jnp.maximum(out, 0.0)
    out = out + residual
    return jnp.maximum(out, 0.0)


if __name__ == "__main__":
    # Small shapes: batch=2, inplanes=planes=4, spatial=16x16, stride=1, no downsample.
    N, C, H, W = 2, 4, 16, 16
    key = jax.random.PRNGKey(0)
    ks = jax.random.split(key, 8)

    x = jax.random.normal(ks[0], (N, C, H, W), jnp.float32)

    params = {
        # conv weights in PyTorch OIHW layout (Cout, Cin, 3, 3), bias=False
        "conv1_w": 0.1 * jax.random.normal(ks[1], (C, C, 3, 3), jnp.float32),
        "conv2_w": 0.1 * jax.random.normal(ks[2], (C, C, 3, 3), jnp.float32),
        # BN params (eval mode, deterministic synthetic running stats)
        "bn1_gamma": 1.0 + 0.1 * jax.random.normal(ks[3], (C,), jnp.float32),
        "bn1_beta": 0.1 * jax.random.normal(ks[4], (C,), jnp.float32),
        "bn1_mean": 0.05 * jax.random.normal(ks[5], (C,), jnp.float32),
        "bn1_var": 1.0 + 0.1 * jnp.abs(jax.random.normal(ks[6], (C,), jnp.float32)),
        "bn2_gamma": 1.0 + 0.1 * jax.random.normal(ks[7], (C,), jnp.float32),
        "bn2_beta": jnp.linspace(-0.1, 0.1, C, dtype=jnp.float32),
        "bn2_mean": jnp.linspace(-0.05, 0.05, C, dtype=jnp.float32),
        "bn2_var": jnp.linspace(0.9, 1.1, C, dtype=jnp.float32),
    }

    out = jax.block_until_ready(basic_block_forward(x, params))
    ref = jax.block_until_ready(_reference_forward(x, params))

    assert out.shape == (N, C, H, W) and out.dtype == jnp.float32
    # bf16 MXU operands (f32 accumulation) -> loosened tolerance vs f32 ref.
    max_err = jnp.max(jnp.abs(out - ref))
    assert jnp.allclose(out, ref, atol=5e-2, rtol=5e-2), f"max abs err {max_err}"

    print("KERNEL_OK")
</pallas_src>

<mosaic_0001>
module attributes {stable_mosaic.version = 11 : i64} {
  func.func @kernel(%arg0: i32, %arg1: memref<2x8x256xf32, #tpu.memory_space<vmem>>, %arg2: memref<8x72xbf16, #tpu.memory_space<vmem>>, %arg3: memref<8x1xf32, #tpu.memory_space<vmem>>, %arg4: memref<8x72xbf16, #tpu.memory_space<vmem>>, %arg5: memref<8x1xf32, #tpu.memory_space<vmem>>, %arg6: memref<9x512xf32, #tpu.memory_space<vmem>>, %arg7: memref<2x8x256xf32, #tpu.memory_space<vmem>>, %arg8: memref<8x512xf32, #tpu.memory_space<vmem>>, %arg9: memref<72x512xbf16, #tpu.memory_space<vmem>>) attributes {dimension_semantics = [#tpu.dimension_semantics<arbitrary>], iteration_bounds = array<i64: 1>, scalar_prefetch = 0 : i64, scratch_operands = 2 : i64, tpu.core_type = #tpu.core_type<tc>, window_params = [{pipeline_mode = #tpu.pipeline_mode<synchronous>, transform_indices = @transform_0, window_bounds = array<i64: 2, 8, 256>}, {pipeline_mode = #tpu.pipeline_mode<synchronous>, transform_indices = @transform_1, window_bounds = array<i64: 8, 72>}, {pipeline_mode = #tpu.pipeline_mode<synchronous>, transform_indices = @transform_2, window_bounds = array<i64: 8, 1>}, {pipeline_mode = #tpu.pipeline_mode<synchronous>, transform_indices = @transform_3, window_bounds = array<i64: 8, 72>}, {pipeline_mode = #tpu.pipeline_mode<synchronous>, transform_indices = @transform_4, window_bounds = array<i64: 8, 1>}, {pipeline_mode = #tpu.pipeline_mode<synchronous>, transform_indices = @transform_5, window_bounds = array<i64: 9, 512>}, {pipeline_mode = #tpu.pipeline_mode<synchronous>, transform_indices = @transform_6, window_bounds = array<i64: 2, 8, 256>}]} {
    %c0 = arith.constant 0 : index
    %c0_0 = arith.constant 0 : index
    %c0_1 = arith.constant 0 : index
    %0 = vector.load %arg1[%c0, %c0_0, %c0_1] : memref<2x8x256xf32, #tpu.memory_space<vmem>>, vector<1x8x256xf32>
    %1 = vector.shape_cast %0 : vector<1x8x256xf32> to vector<8x256xf32>
    %c0_2 = arith.constant 0 : index
    %c0_3 = arith.constant 0 : index
    %2 = vector.load %arg8[%c0_2, %c0_3] : memref<8x512xf32, #tpu.memory_space<vmem>>, vector<8x256xf32>
    tpu.vector_store %arg8[%c0_2, %c0_3], %1 {strides = array<i32>} : memref<8x512xf32, #tpu.memory_space<vmem>>, vector<8x256xf32>,
    %c1 = arith.constant 1 : index
    %c0_4 = arith.constant 0 : index
    %c0_5 = arith.constant 0 : index
    %3 = vector.load %arg1[%c1, %c0_4, %c0_5] : memref<2x8x256xf32, #tpu.memory_space<vmem>>, vector<1x8x256xf32>
    %4 = vector.shape_cast %3 : vector<1x8x256xf32> to vector<8x256xf32>
    %c0_6 = arith.constant 0 : index
    %c256 = arith.constant 256 : index
    %5 = vector.load %arg8[%c0_6, %c256] : memref<8x512xf32, #tpu.memory_space<vmem>>, vector<8x256xf32>
    tpu.vector_store %arg8[%c0_6, %c256], %4 {strides = array<i32>} : memref<8x512xf32, #tpu.memory_space<vmem>>, vector<8x256xf32>,
    %c0_7 = arith.constant 0 : index
    %c0_8 = arith.constant 0 : index
    %6 = vector.load %arg8[%c0_7, %c0_8] : memref<8x512xf32, #tpu.memory_space<vmem>>, vector<8x512xf32>
    %c17_i32 = arith.constant 17 : i32
    %7 = tpu.dynamic_rotate %6 by %c17_i32 dim 1 : vector<8x512xf32>, i32 -> vector<8x512xf32>
    %c0_9 = arith.constant 0 : index
    %c0_10 = arith.constant 0 : index
    %8 = vector.load %arg6[%c0_9, %c0_10] : memref<9x512xf32, #tpu.memory_space<vmem>>, vector<1x512xf32>
    %9 = vector.broadcast %8 : vector<1x512xf32> to vector<8x512xf32>
    %10 = arith.mulf %7, %9 : vector<8x512xf32>
    %11 = arith.truncf %10 : vector<8x512xf32> to vector<8x512xbf16>
    %c0_11 = arith.constant 0 : index
    %c0_12 = arith.constant 0 : index
    %12 = vector.load %arg9[%c0_11, %c0_12] : memref<72x512xbf16, #tpu.memory_space<vmem>>, vector<8x512xbf16>
    tpu.vector_store %arg9[%c0_11, %c0_12], %11 {strides = array<i32>} : memref<72x512xbf16, #tpu.memory_space<vmem>>, vector<8x512xbf16>,
    %c16_i32 = arith.constant 16 : i32
    %13 = tpu.dynamic_rotate %6 by %c16_i32 dim 1 : vector<8x512xf32>, i32 -> vector<8x512xf32>
    %c1_13 = arith.constant 1 : index
    %c0_14 = arith.constant 0 : index
    %14 = vector.load %arg6[%c1_13, %c0_14] : memref<9x512xf32, #tpu.memory_space<vmem>>, vector<1x512xf32>
    %15 = vector.broadcast %14 : vector<1x512xf32> to vector<8x512xf32>
    %16 = arith.mulf %13, %15 : vector<8x512xf32>
    %17 = arith.truncf %16 : vector<8x512xf32> to vector<8x512xbf16>
    %c8 = arith.constant 8 : index
    %c0_15 = arith.constant 0 : index
    %18 = vector.load %arg9[%c8, %c0_15] : memref<72x512xbf16, #tpu.memory_space<vmem>>, vector<8x512xbf16>
    tpu.vector_store %arg9[%c8, %c0_15], %17 {strides = array<i32>} : memref<72x512xbf16, #tpu.memory_space<vmem>>, vector<8x512xbf16>,
    %c15_i32 = arith.constant 15 : i32
    %19 = tpu.dynamic_rotate %6 by %c15_i32 dim 1 : vector<8x512xf32>, i32 -> vector<8x512xf32>
    %c2 = arith.constant 2 : index
    %c0_16 = arith.constant 0 : index
    %20 = vector.load %arg6[%c2, %c0_16] : memref<9x512xf32, #tpu.memory_space<vmem>>, vector<1x512xf32>
    %21 = vector.broadcast %20 : vector<1x512xf32> to vector<8x512xf32>
    %22 = arith.mulf %19, %21 : vector<8x512xf32>
    %23 = arith.truncf %22 : vector<8x512xf32> to vector<8x512xbf16>
    %c16 = arith.constant 16 : index
    %c0_17 = arith.constant 0 : index
    %24 = vector.load %arg9[%c16, %c0_17] : memref<72x512xbf16, #tpu.memory_space<vmem>>, vector<8x512xbf16>
    tpu.vector_store %arg9[%c16, %c0_17], %23 {strides = array<i32>} : memref<72x512xbf16, #tpu.memory_space<vmem>>, vector<8x512xbf16>,
    %c1_i32 = arith.constant 1 : i32
    %25 = tpu.dynamic_rotate %6 by %c1_i32 dim 1 : vector<8x512xf32>, i32 -> vector<8x512xf32>
    %c3 = arith.constant 3 : index
    %c0_18 = arith.constant 0 : index
    %26 = vector.load %arg6[%c3, %c0_18] : memref<9x512xf32, #tpu.memory_space<vmem>>, vector<1x512xf32>
    %27 = vector.broadcast %26 : vector<1x512xf32> to vector<8x512xf32>
    %28 = arith.mulf %25, %27 : vector<8x512xf32>
    %29 = arith.truncf %28 : vector<8x512xf32> to vector<8x512xbf16>
    %c24 = arith.constant 24 : index
    %c0_19 = arith.constant 0 : index
    %30 = vector.load %arg9[%c24, %c0_19] : memref<72x512xbf16, #tpu.memory_space<vmem>>, vector<8x512xbf16>
    tpu.vector_store %arg9[%c24, %c0_19], %29 {strides = array<i32>} : memref<72x512xbf16, #tpu.memory_space<vmem>>, vector<8x512xbf16>,
    %31 = arith.truncf %6 : vector<8x512xf32> to vector<8x512xbf16>
    %c32 = arith.constant 32 : index
    %c0_20 = arith.constant 0 : index
    %32 = vector.load %arg9[%c32, %c0_20] : memref<72x512xbf16, #tpu.memory_space<vmem>>, vector<8x512xbf16>
    tpu.vector_store %arg9[%c32, %c0_20], %31 {strides = array<i32>} : memref<72x512xbf16, #tpu.memory_space<vmem>>, vector<8x512xbf16>,
    %c511_i32 = arith.constant 511 : i32
    %33 = tpu.dynamic_rotate %6 by %c511_i32 dim 1 : vector<8x512xf32>, i32 -> vector<8x512xf32>
    %c5 = arith.constant 5 : index
    %c0_21 = arith.constant 0 : index
    %34 = vector.load %arg6[%c5, %c0_21] : memref<9x512xf32, #tpu.memory_space<vmem>>, vector<1x512xf32>
    %35 = vector.broadcast %34 : vector<1x512xf32> to vector<8x512xf32>
    %36 = arith.mulf %33, %35 : vector<8x512xf32>
    %37 = arith.truncf %36 : vector<8x512xf32> to vector<8x512xbf16>
    %c40 = arith.constant 40 : index
    %c0_22 = arith.constant 0 : index
    %38 = vector.load %arg9[%c40, %c0_22] : memref<72x512xbf16, #tpu.memory_space<vmem>>, vector<8x512xbf16>
    tpu.vector_store %arg9[%c40, %c0_22], %37 {strides = array<i32>} : memref<72x512xbf16, #tpu.memory_space<vmem>>, vector<8x512xbf16>,
    %c497_i32 = arith.constant 497 : i32
    %39 = tpu.dynamic_rotate %6 by %c497_i32 dim 1 : vector<8x512xf32>, i32 -> vector<8x512xf32>
    %c6 = arith.constant 6 : index
    %c0_23 = arith.constant 0 : index
    %40 = vector.load %arg6[%c6, %c0_23] : memref<9x512xf32, #tpu.memory_space<vmem>>, vector<1x512xf32>
    %41 = vector.broadcast %40 : vector<1x512xf32> to vector<8x512xf32>
    %42 = arith.mulf %39, %41 : vector<8x512xf32>
    %43 = arith.truncf %42 : vector<8x512xf32> to vector<8x512xbf16>
    %c48 = arith.constant 48 : index
    %c0_24 = arith.constant 0 : index
    %44 = vector.load %arg9[%c48, %c0_24] : memref<72x512xbf16, #tpu.memory_space<vmem>>, vector<8x512xbf16>
    tpu.vector_store %arg9[%c48, %c0_24], %43 {strides = array<i32>} : memref<72x512xbf16, #tpu.memory_space<vmem>>, vector<8x512xbf16>,
    %c496_i32 = arith.constant 496 : i32
    %45 = tpu.dynamic_rotate %6 by %c496_i32 dim 1 : vector<8x512xf32>, i32 -> vector<8x512xf32>
    %c7 = arith.constant 7 : index
    %c0_25 = arith.constant 0 : index
    %46 = vector.load %arg6[%c7, %c0_25] : memref<9x512xf32, #tpu.memory_space<vmem>>, vector<1x512xf32>
    %47 = vector.broadcast %46 : vector<1x512xf32> to vector<8x512xf32>
    %48 = arith.mulf %45, %47 : vector<8x512xf32>
    %49 = arith.truncf %48 : vector<8x512xf32> to vector<8x512xbf16>
    %c56 = arith.constant 56 : index
    %c0_26 = arith.constant 0 : index
    %50 = vector.load %arg9[%c56, %c0_26] : memref<72x512xbf16, #tpu.memory_space<vmem>>, vector<8x512xbf16>
    tpu.vector_store %arg9[%c56, %c0_26], %49 {strides = array<i32>} : memref<72x512xbf16, #tpu.memory_space<vmem>>, vector<8x512xbf16>,
    %c495_i32 = arith.constant 495 : i32
    %51 = tpu.dynamic_rotate %6 by %c495_i32 dim 1 : vector<8x512xf32>, i32 -> vector<8x512xf32>
    %c8_27 = arith.constant 8 : index
    %c0_28 = arith.constant 0 : index
    %52 = vector.load %arg6[%c8_27, %c0_28] : memref<9x512xf32, #tpu.memory_space<vmem>>, vector<1x512xf32>
    %53 = vector.broadcast %52 : vector<1x512xf32> to vector<8x512xf32>
    %54 = arith.mulf %51, %53 : vector<8x512xf32>
    %55 = arith.truncf %54 : vector<8x512xf32> to vector<8x512xbf16>
    %c64 = arith.constant 64 : index
    %c0_29 = arith.constant 0 : index
    %56 = vector.load %arg9[%c64, %c0_29] : memref<72x512xbf16, #tpu.memory_space<vmem>>, vector<8x512xbf16>
    tpu.vector_store %arg9[%c64, %c0_29], %55 {strides = array<i32>} : memref<72x512xbf16, #tpu.memory_space<vmem>>, vector<8x512xbf16>,
    %c0_30 = arith.constant 0 : index
    %c0_31 = arith.constant 0 : index
    %57 = vector.load %arg2[%c0_30, %c0_31] : memref<8x72xbf16, #tpu.memory_space<vmem>>, vector<8x72xbf16>
    %c0_32 = arith.constant 0 : index
    %c0_33 = arith.constant 0 : index
    %58 = vector.load %arg9[%c0_32, %c0_33] : memref<72x512xbf16, #tpu.memory_space<vmem>>, vector<72x512xbf16>
    %cst = arith.constant dense<0.000000e+00> : vector<8x512xf32>
    %59 = tpu.matmul %57, %58, %cst {dimension_numbers = #tpu.dot_dimension_numbers<[1], [0], [0], [1], [0, 0, 1, 1], [], []>} : vector<8x72xbf16>, vector<72x512xbf16>, vector<8x512xf32> -> vector<8x512xf32>
    %c0_34 = arith.constant 0 : index
    %c0_35 = arith.constant 0 : index
    %60 = vector.load %arg3[%c0_34, %c0_35] : memref<8x1xf32, #tpu.memory_space<vmem>>, vector<8x1xf32>
    %61 = vector.broadcast %60 : vector<8x1xf32> to vector<8x512xf32>
    %62 = arith.addf %59, %61 : vector<8x512xf32>
    %cst_36 = arith.constant 0.000000e+00 : f32
    %63 = vector.broadcast %cst_36 : f32 to vector<8x512xf32>
    %64 = arith.maximumf %62, %63 : vector<8x512xf32>
    %c17_i32_37 = arith.constant 17 : i32
    %65 = tpu.dynamic_rotate %64 by %c17_i32_37 dim 1 : vector<8x512xf32>, i32 -> vector<8x512xf32>
    %c0_38 = arith.constant 0 : index
    %c0_39 = arith.constant 0 : index
    %66 = vector.load %arg6[%c0_38, %c0_39] : memref<9x512xf32, #tpu.memory_space<vmem>>, vector<1x512xf32>
    %67 = vector.broadcast %66 : vector<1x512xf32> to vector<8x512xf32>
    %68 = arith.mulf %65, %67 : vector<8x512xf32>
    %69 = arith.truncf %68 : vector<8x512xf32> to vector<8x512xbf16>
    %c0_40 = arith.constant 0 : index
    %c0_41 = arith.constant 0 : index
    %70 = vector.load %arg9[%c0_40, %c0_41] : memref<72x512xbf16, #tpu.memory_space<vmem>>, vector<8x512xbf16>
    tpu.vector_store %arg9[%c0_40, %c0_41], %69 {strides = array<i32>} : memref<72x512xbf16, #tpu.memory_space<vmem>>, vector<8x512xbf16>,
    %c16_i32_42 = arith.constant 16 : i32
    %71 = tpu.dynamic_rotate %64 by %c16_i32_42 dim 1 : vector<8x512xf32>, i32 -> vector<8x512xf32>
    %c1_43 = arith.constant 1 : index
    %c0_44 = arith.constant 0 : index
    %72 = vector.load %arg6[%c1_43, %c0_44] : memref<9x512xf32, #tpu.memory_space<vmem>>, vector<1x512xf32>
    %73 = vector.broadcast %72 : vector<1x512xf32> to vector<8x512xf32>
    %74 = arith.mulf %71, %73 : vector<8x512xf32>
    %75 = arith.truncf %74 : vector<8x512xf32> to vector<8x512xbf16>
    %c8_45 = arith.constant 8 : index
    %c0_46 = arith.constant 0 : index
    %76 = vector.load %arg9[%c8_45, %c0_46] : memref<72x512xbf16, #tpu.memory_space<vmem>>, vector<8x512xbf16>
    tpu.vector_store %arg9[%c8_45, %c0_46], %75 {strides = array<i32>} : memref<72x512xbf16, #tpu.memory_space<vmem>>, vector<8x512xbf16>,
    %c15_i32_47 = arith.constant 15 : i32
    %77 = tpu.dynamic_rotate %64 by %c15_i32_47 dim 1 : vector<8x512xf32>, i32 -> vector<8x512xf32>
    %c2_48 = arith.constant 2 : index
    %c0_49 = arith.constant 0 : index
    %78 = vector.load %arg6[%c2_48, %c0_49] : memref<9x512xf32, #tpu.memory_space<vmem>>, vector<1x512xf32>
    %79 = vector.broadcast %78 : vector<1x512xf32> to vector<8x512xf32>
    %80 = arith.mulf %77, %79 : vector<8x512xf32>
    %81 = arith.truncf %80 : vector<8x512xf32> to vector<8x512xbf16>
    %c16_50 = arith.constant 16 : index
    %c0_51 = arith.constant 0 : index
    %82 = vector.load %arg9[%c16_50, %c0_51] : memref<72x512xbf16, #tpu.memory_space<vmem>>, vector<8x512xbf16>
    tpu.vector_store %arg9[%c16_50, %c0_51], %81 {strides = array<i32>} : memref<72x512xbf16, #tpu.memory_space<vmem>>, vector<8x512xbf16>,
    %c1_i32_52 = arith.constant 1 : i32
    %83 = tpu.dynamic_rotate %64 by %c1_i32_52 dim 1 : vector<8x512xf32>, i32 -> vector<8x512xf32>
    %c3_53 = arith.constant 3 : index
    %c0_54 = arith.constant 0 : index
    %84 = vector.load %arg6[%c3_53, %c0_54] : memref<9x512xf32, #tpu.memory_space<vmem>>, vector<1x512xf32>
    %85 = vector.broadcast %84 : vector<1x512xf32> to vector<8x512xf32>
    %86 = arith.mulf %83, %85 : vector<8x512xf32>
    %87 = arith.truncf %86 : vector<8x512xf32> to vector<8x512xbf16>
    %c24_55 = arith.constant 24 : index
    %c0_56 = arith.constant 0 : index
    %88 = vector.load %arg9[%c24_55, %c0_56] : memref<72x512xbf16, #tpu.memory_space<vmem>>, vector<8x512xbf16>
    tpu.vector_store %arg9[%c24_55, %c0_56], %87 {strides = array<i32>} : memref<72x512xbf16, #tpu.memory_space<vmem>>, vector<8x512xbf16>,
    %89 = arith.truncf %64 : vector<8x512xf32> to vector<8x512xbf16>
    %c32_57 = arith.constant 32 : index
    %c0_58 = arith.constant 0 : index
    %90 = vector.load %arg9[%c32_57, %c0_58] : memref<72x512xbf16, #tpu.memory_space<vmem>>, vector<8x512xbf16>
    tpu.vector_store %arg9[%c32_57, %c0_58], %89 {strides = array<i32>} : memref<72x512xbf16, #tpu.memory_space<vmem>>, vector<8x512xbf16>,
    %c511_i32_59 = arith.constant 511 : i32
    %91 = tpu.dynamic_rotate %64 by %c511_i32_59 dim 1 : vector<8x512xf32>, i32 -> vector<8x512xf32>
    %c5_60 = arith.constant 5 : index
    %c0_61 = arith.constant 0 : index
    %92 = vector.load %arg6[%c5_60, %c0_61] : memref<9x512xf32, #tpu.memory_space<vmem>>, vector<1x512xf32>
    %93 = vector.broadcast %92 : vector<1x512xf32> to vector<8x512xf32>
    %94 = arith.mulf %91, %93 : vector<8x512xf32>
    %95 = arith.truncf %94 : vector<8x512xf32> to vector<8x512xbf16>
    %c40_62 = arith.constant 40 : index
    %c0_63 = arith.constant 0 : index
    %96 = vector.load %arg9[%c40_62, %c0_63] : memref<72x512xbf16, #tpu.memory_space<vmem>>, vector<8x512xbf16>
    tpu.vector_store %arg9[%c40_62, %c0_63], %95 {strides = array<i32>} : memref<72x512xbf16, #tpu.memory_space<vmem>>, vector<8x512xbf16>,
    %c497_i32_64 = arith.constant 497 : i32
    %97 = tpu.dynamic_rotate %64 by %c497_i32_64 dim 1 : vector<8x512xf32>, i32 -> vector<8x512xf32>
    %c6_65 = arith.constant 6 : index
    %c0_66 = arith.constant 0 : index
    %98 = vector.load %arg6[%c6_65, %c0_66] : memref<9x512xf32, #tpu.memory_space<vmem>>, vector<1x512xf32>
    %99 = vector.broadcast %98 : vector<1x512xf32> to vector<8x512xf32>
    %100 = arith.mulf %97, %99 : vector<8x512xf32>
    %101 = arith.truncf %100 : vector<8x512xf32> to vector<8x512xbf16>
    %c48_67 = arith.constant 48 : index
    %c0_68 = arith.constant 0 : index
    %102 = vector.load %arg9[%c48_67, %c0_68] : memref<72x512xbf16, #tpu.memory_space<vmem>>, vector<8x512xbf16>
    tpu.vector_store %arg9[%c48_67, %c0_68], %101 {strides = array<i32>} : memref<72x512xbf16, #tpu.memory_space<vmem>>, vector<8x512xbf16>,
    %c496_i32_69 = arith.constant 496 : i32
    %103 = tpu.dynamic_rotate %64 by %c496_i32_69 dim 1 : vector<8x512xf32>, i32 -> vector<8x512xf32>
    %c7_70 = arith.constant 7 : index
    %c0_71 = arith.constant 0 : index
    %104 = vector.load %arg6[%c7_70, %c0_71] : memref<9x512xf32, #tpu.memory_space<vmem>>, vector<1x512xf32>
    %105 = vector.broadcast %104 : vector<1x512xf32> to vector<8x512xf32>
    %106 = arith.mulf %103, %105 : vector<8x512xf32>
    %107 = arith.truncf %106 : vector<8x512xf32> to vector<8x512xbf16>
    %c56_72 = arith.constant 56 : index
    %c0_73 = arith.constant 0 : index
    %108 = vector.load %arg9[%c56_72, %c0_73] : memref<72x512xbf16, #tpu.memory_space<vmem>>, vector<8x512xbf16>
    tpu.vector_store %arg9[%c56_72, %c0_73], %107 {strides = array<i32>} : memref<72x512xbf16, #tpu.memory_space<vmem>>, vector<8x512xbf16>,
    %c495_i32_74 = arith.constant 495 : i32
    %109 = tpu.dynamic_rotate %64 by %c495_i32_74 dim 1 : vector<8x512xf32>, i32 -> vector<8x512xf32>
    %c8_75 = arith.constant 8 : index
    %c0_76 = arith.constant 0 : index
    %110 = vector.load %arg6[%c8_75, %c0_76] : memref<9x512xf32, #tpu.memory_space<vmem>>, vector<1x512xf32>
    %111 = vector.broadcast %110 : vector<1x512xf32> to vector<8x512xf32>
    %112 = arith.mulf %109, %111 : vector<8x512xf32>
    %113 = arith.truncf %112 : vector<8x512xf32> to vector<8x512xbf16>
    %c64_77 = arith.constant 64 : index
    %c0_78 = arith.constant 0 : index
    %114 = vector.load %arg9[%c64_77, %c0_78] : memref<72x512xbf16, #tpu.memory_space<vmem>>, vector<8x512xbf16>
    tpu.vector_store %arg9[%c64_77, %c0_78], %113 {strides = array<i32>} : memref<72x512xbf16, #tpu.memory_space<vmem>>, vector<8x512xbf16>,
    %c0_79 = arith.constant 0 : index
    %c0_80 = arith.constant 0 : index
    %115 = vector.load %arg4[%c0_79, %c0_80] : memref<8x72xbf16, #tpu.memory_space<vmem>>, vector<8x72xbf16>
    %c0_81 = arith.constant 0 : index
    %c0_82 = arith.constant 0 : index
    %116 = vector.load %arg9[%c0_81, %c0_82] : memref<72x512xbf16, #tpu.memory_space<vmem>>, vector<72x512xbf16>
    %cst_83 = arith.constant dense<0.000000e+00> : vector<8x512xf32>
    %117 = tpu.matmul %115, %116, %cst_83 {dimension_numbers = #tpu.dot_dimension_numbers<[1], [0], [0], [1], [0, 0, 1, 1], [], []>} : vector<8x72xbf16>, vector<72x512xbf16>, vector<8x512xf32> -> vector<8x512xf32>
    %c0_84 = arith.constant 0 : index
    %c0_85 = arith.constant 0 : index
    %118 = vector.load %arg5[%c0_84, %c0_85] : memref<8x1xf32, #tpu.memory_space<vmem>>, vector<8x1xf32>
    %119 = vector.broadcast %118 : vector<8x1xf32> to vector<8x512xf32>
    %120 = arith.addf %117, %119 : vector<8x512xf32>
    %cst_86 = arith.constant 0.000000e+00 : f32
    %121 = vector.broadcast %cst_86 : f32 to vector<8x512xf32>
    %122 = arith.maximumf %120, %121 : vector<8x512xf32>
    %123 = arith.addf %122, %6 : vector<8x512xf32>
    %cst_87 = arith.constant 0.000000e+00 : f32
    %124 = vector.broadcast %cst_87 : f32 to vector<8x512xf32>
    %125 = arith.maximumf %123, %124 : vector<8x512xf32>
    %126 = vector.extract_strided_slice %125 {offsets = [0, 0], sizes = [8, 256], strides = [1, 1]} : vector<8x512xf32> to vector<8x256xf32>
    %c0_88 = arith.constant 0 : index
    %c0_89 = arith.constant 0 : index
    %c0_90 = arith.constant 0 : index
    %127 = vector.load %arg7[%c0_88, %c0_89, %c0_90] : memref<2x8x256xf32, #tpu.memory_space<vmem>>, vector<1x8x256xf32>
    %128 = vector.shape_cast %127 : vector<1x8x256xf32> to vector<8x256xf32>
    %129 = vector.shape_cast %126 : vector<8x256xf32> to vector<1x8x256xf32>
    tpu.vector_store %arg7[%c0_88, %c0_89, %c0_90], %129 {strides = array<i32>} : memref<2x8x256xf32, #tpu.memory_space<vmem>>, vector<1x8x256xf32>,
    %130 = vector.extract_strided_slice %125 {offsets = [0, 256], sizes = [8, 256], strides = [1, 1]} : vector<8x512xf32> to vector<8x256xf32>
    %c1_91 = arith.constant 1 : index
    %c0_92 = arith.constant 0 : index
    %c0_93 = arith.constant 0 : index
    %131 = vector.load %arg7[%c1_91, %c0_92, %c0_93] : memref<2x8x256xf32, #tpu.memory_space<vmem>>, vector<1x8x256xf32>
    %132 = vector.shape_cast %131 : vector<1x8x256xf32> to vector<8x256xf32>
    %133 = vector.shape_cast %130 : vector<8x256xf32> to vector<1x8x256xf32>
    tpu.vector_store %arg7[%c1_91, %c0_92, %c0_93], %133 {strides = array<i32>} : memref<2x8x256xf32, #tpu.memory_space<vmem>>, vector<1x8x256xf32>,
    return
  }
  func.func @transform_0(%arg0: i32) -> (i32, i32, i32) {
    %c0_i32 = arith.constant 0 : i32
    %c0_i32_0 = arith.constant 0 : i32
    %c0_i32_1 = arith.constant 0 : i32
    %c0_i32_2 = arith.constant 0 : i32
    return %c0_i32, %c0_i32_0, %c0_i32_1 : i32, i32, i32
  }
  func.func @transform_1(%arg0: i32) -> (i32, i32) {
    %c0_i32 = arith.constant 0 : i32
    %c0_i32_0 = arith.constant 0 : i32
    %c0_i32_1 = arith.constant 0 : i32
    return %c0_i32, %c0_i32_0 : i32, i32
  }
  func.func @transform_2(%arg0: i32) -> (i32, i32) {
    %c0_i32 = arith.constant 0 : i32
    %c0_i32_0 = arith.constant 0 : i32
    %c0_i32_1 = arith.constant 0 : i32
    return %c0_i32, %c0_i32_0 : i32, i32
  }
  func.func @transform_3(%arg0: i32) -> (i32, i32) {
    %c0_i32 = arith.constant 0 : i32
    %c0_i32_0 = arith.constant 0 : i32
    %c0_i32_1 = arith.constant 0 : i32
    return %c0_i32, %c0_i32_0 : i32, i32
  }
  func.func @transform_4(%arg0: i32) -> (i32, i32) {
    %c0_i32 = arith.constant 0 : i32
    %c0_i32_0 = arith.constant 0 : i32
    %c0_i32_1 = arith.constant 0 : i32
    return %c0_i32, %c0_i32_0 : i32, i32
  }
  func.func @transform_5(%arg0: i32) -> (i32, i32) {
    %c0_i32 = arith.constant 0 : i32
    %c0_i32_0 = arith.constant 0 : i32
    %c0_i32_1 = arith.constant 0 : i32
    return %c0_i32, %c0_i32_0 : i32, i32
  }
  func.func @transform_6(%arg0: i32) -> (i32, i32, i32) {
    %c0_i32 = arith.constant 0 : i32
    %c0_i32_0 = arith.constant 0 : i32
    %c0_i32_1 = arith.constant 0 : i32
    %c0_i32_2 = arith.constant 0 : i32
    return %c0_i32, %c0_i32_0, %c0_i32_1 : i32, i32, i32
  }
}

</mosaic_0001>

<bundles_post_ra>
// kernel: basic_block_forward.1
= control target key start
LH: loop header
LB: loop body
LE: loop exit
PB: predicated region body
PF: predicated region fallthrough
CT: control target
= control target key end

     0   :  { %s1625_s25 = smov 17   ;;  %s1626_s30 = smov 16   ;;  %v1632_v4 = vmov 0   ;;  %v45_v6 = vlaneseq  ;;  %vm639_vm8 = vcmask 1043456   ;;  %vm635_vm9 = vcmask 588800   ;;  %s2136_s0 = inlined_call_operand.vmem [shape: f32[2,8,256], index: 0, kind: input, shape index: {}]   ;;  %s2137_s2 = inlined_call_operand.vmem [shape: f32[8,1], index: 2, kind: input, shape index: {}]   ;;  %s2138_s5 = inlined_call_operand.vmem [shape: f32[9,512], index: 5, kind: input, shape index: {}]   ;;  %s2139_s1 = inlined_call_operand.vmem [shape: bf16[8,72], index: 1, kind: input, shape index: {}]   ;;  %s2140_s4 = inlined_call_operand.vmem [shape: f32[8,1], index: 4, kind: input, shape index: {}]   ;;  %s2141_s3 = inlined_call_operand.vmem [shape: bf16[8,72], index: 3, kind: input, shape index: {}]   ;;  %s2142_s6 = inlined_call_operand.vmem [shape: f32[2,8,256], index: 6, kind: output, shape index: {}]  }
   0x1   :  { %v1672_v0 = vld [vmem:[%s2136_s0 + $0x10] sm:$0xff]  ;;  %v1677_v1 = vld [vmem:[%s2136_s0] sm:$0xff]  ;;  %v1686_v2 = vld [vmem:[%s2136_s0 + $0x18] sm:$0xff]  ;;  %s1628_s7 = smov 1   ;;  %s1629_s8 = smov 127   ;;  %684 = vmatprep.mubr.bf16.mxu0 %v1632_v4  ;;  %725 = vmatprep.mubr.bf16.mxu1 %v1632_v4 }
   0x2   :  { %41 = vrot.lane.b32.xlu1 %v1672_v0, %s1625_s25  ;;  %37 = vrot.lane.b32.xlu0 %v1677_v1, %s1625_s25  ;;  %v1691_v3 = vld [vmem:[%s2136_s0 + $0x8] sm:$0xff]  ;;  %s1627_s0 = smov 15   ;;  %s1630_s9 = smov 113   ;;  %v539_v5 = vld [vmem:[%s2137_s2] sm:$0xff]  ;;  %v55_v7 = vshrl.u32 %v45_v6, 7  ;;  %v1759_v10 = vand.u32 127, %v45_v6 }
   0x3   :  { %s1631_s10 = smov 112   ;;  %1624 = vset.pattern.permute.xlu0 %v1632_v4  ;;  %s1633_s11 = smov 111   ;;  %v52_v12 = vld [vmem:[%s2138_s5] ss:$8 sm:$0xf] }
   0x4   :  { %v1761_v11 = vsub.s32 1, %v55_v7  ;;  %v1441_v13 = vld [vmem:[%s2138_s5 + $0x1] ss:$8 sm:$0xf]  ;;  %vm47_vm0 = vcmp.lt.s32.totalorder %v1759_v10, 17  ;;  %v1770_v14 = vsub.s32 0, %v55_v7 }
   0x5   :  { %v1772_v15 = vsub.s32 2, %v55_v7  ;;  %v1774_v18 = vsub.s32 3, %v55_v7  ;;  %vm104_vm1 = vcmp.lt.s32.totalorder %v1759_v10, 16  ;;  %v1444_v53 = vld [vmem:[%s2138_s5 + $0x2] ss:$8 sm:$0xf] }
   0x6   :  { %43 = vrot.lane.b32.xlu1 %v1686_v2, %s1625_s25  ;;  %39 = vrot.lane.b32.xlu0 %v1691_v3, %s1625_s25  ;;  %v61_v19 = vrot.slane %v52_v12, %v1761_v11  ;;  %v119_v20 = vrot.slane %v1441_v13, %v1761_v11  ;;  %v57_v22 = vrot.slane %v52_v12, %v1770_v14  ;;  %v1447_v54 = vld [vmem:[%s2138_s5 + $0x3] ss:$8 sm:$0xf]  ;;  %vm162_vm2 = vcmp.lt.s32.totalorder %v1759_v10, 15 }
   0x7   :  { %v65_v23 = vrot.slane %v52_v12, %v1772_v15  ;;  %v115_v26 = vrot.slane %v1441_v13, %v1770_v14  ;;  %v123_v29 = vrot.slane %v1441_v13, %v1772_v15  ;;  %v69_v30 = vrot.slane %v52_v12, %v1774_v18 }
   0x8   :  { %v127_v34 = vrot.slane %v1441_v13, %v1774_v18  ;;  %v177_v57 = vrot.slane %v1444_v53, %v1761_v11  ;;  %vm220_vm3 = vcmp.lt.s32.totalorder %v1759_v10, 1  ;;  %v235_v58 = vrot.slane %v1447_v54, %v1761_v11 }
   0x9   :  { %v173_v60 = vrot.slane %v1444_v53, %v1770_v14  ;;  %v181_v61 = vrot.slane %v1444_v53, %v1772_v15  ;;  %v185_v62 = vrot.slane %v1444_v53, %v1774_v18  ;;  %vm296_vm4 = vcmp.lt.s32.totalorder %v1759_v10, 127 }
   0xa   :  { %98 = vrot.lane.b32.xlu1 %v1691_v3, %s1626_s30  ;;  %96 = vrot.lane.b32.xlu0 %v1677_v1, %s1626_s30  ;;  %vm412_vm5 = vcmp.lt.s32.totalorder %v1759_v10, 112  ;;  %vm354_vm6 = vcmp.lt.s32.totalorder %v1759_v10, 113  ;;  %vm470_vm7 = vcmp.lt.s32.totalorder %v1759_v10, 111 }
   0xe   :  { %102 = vrot.lane.b32.xlu1 %v1686_v2, %s1626_s30  ;;  %100 = vrot.lane.b32.xlu0 %v1672_v0, %s1626_s30 }
  0x12   :  { %156 = vrot.lane.b32.xlu1 %v1691_v3, %s1627_s0  ;;  %154 = vrot.lane.b32.xlu0 %v1677_v1, %s1627_s0 }
  0x16   :  { %160 = vrot.lane.b32.xlu1 %v1686_v2, %s1627_s0  ;;  %158 = vrot.lane.b32.xlu0 %v1672_v0, %s1627_s0 }
  0x1a   :  { %214 = vrot.lane.b32.xlu1 %v1691_v3, %s1628_s7  ;;  %212 = vrot.lane.b32.xlu0 %v1677_v1, %s1628_s7 }
  0x1e   :  { %218 = vrot.lane.b32.xlu1 %v1686_v2, %s1628_s7  ;;  %216 = vrot.lane.b32.xlu0 %v1672_v0, %s1628_s7 }
  0x22   :  { %290 = vrot.lane.b32.xlu1 %v1691_v3, %s1629_s8  ;;  %288 = vrot.lane.b32.xlu0 %v1677_v1, %s1629_s8 }
  0x26   :  { %294 = vrot.lane.b32.xlu1 %v1686_v2, %s1629_s8  ;;  %292 = vrot.lane.b32.xlu0 %v1672_v0, %s1629_s8 }
  0x2a   :  { %348 = vrot.lane.b32.xlu1 %v1691_v3, %s1630_s9  ;;  %346 = vrot.lane.b32.xlu0 %v1677_v1, %s1630_s9 }
  0x2e   :  { %352 = vrot.lane.b32.xlu1 %v1686_v2, %s1630_s9  ;;  %350 = vrot.lane.b32.xlu0 %v1672_v0, %s1630_s9 }
  0x32   :  { %406 = vrot.lane.b32.xlu1 %v1691_v3, %s1631_s10  ;;  %404 = vrot.lane.b32.xlu0 %v1677_v1, %s1631_s10 }
  0x36   :  { %410 = vrot.lane.b32.xlu1 %v1686_v2, %s1631_s10  ;;  %408 = vrot.lane.b32.xlu0 %v1672_v0, %s1631_s10 }
  0x3a   :  { %464 = vrot.lane.b32.xlu1 %v1691_v3, %s1633_s11  ;;  %462 = vrot.lane.b32.xlu0 %v1677_v1, %s1633_s11 }
  0x3e   :  { %468 = vrot.lane.b32.xlu1 %v1686_v2, %s1633_s11  ;;  %466 = vrot.lane.b32.xlu0 %v1672_v0, %s1633_s11 }
  0x42   :  { %542 = vperm.xlu0 %1624, %v539_v5  }
  0x74   :  { %v42_v8 = vpop.permute.xlu1 %41  ;;  %v38_v9 = vpop.permute.xlu0 %37 }
  0x78   :  { %v44_v16 = vpop.permute.xlu1 %43  ;;  %v40_v17 = vpop.permute.xlu0 %39 }
  0x79   :  { %v50_v21 = vsel %vm47_vm0, %v38_v9, %v40_v17  ;;  %v51_v27 = vsel %vm47_vm0, %v44_v16, %v38_v9  ;;  %v49_v31 = vsel %vm47_vm0, %v40_v17, %v42_v8  ;;  %v48_v35 = vsel %vm47_vm0, %v42_v8, %v44_v16 }
  0x7a   :  { %v75_v32 = vmul.f32 %v61_v19, %v50_v21  ;;  %v74_v36 = vmul.f32 %v57_v22, %v51_v27  ;;  %v76_v40 = vmul.f32 %v65_v23, %v49_v31  ;;  %v77_v46 = vmul.f32 %v69_v30, %v48_v35 }
  0x7b   :  { %v231_v8 = vrot.slane %v1447_v54, %v1770_v14  ;;  %v239_v9 = vrot.slane %v1447_v54, %v1772_v15  ;;  %v243_v17 = vrot.slane %v1447_v54, %v1774_v18 }
  0x7c   :  { %v99_v24 = vpop.permute.xlu1 %98  ;;  %v97_v25 = vpop.permute.xlu0 %96 }
  0x7d   :  { %v107_v28 = vsel %vm104_vm1, %v97_v25, %v99_v24 }
  0x7e   :  { %v133_v33 = vmul.f32 %v119_v20, %v107_v28 }
  0x80   :  { %v103_v37 = vpop.permute.xlu1 %102  ;;  %v101_v38 = vpop.permute.xlu0 %100  ;;  %v1576_v39 = vpack.c.bf16 %v133_v33, %v75_v32  ;;  %v1452_v32 = vld [vmem:[%s2138_s5 + $0x5] ss:$8 sm:$0xf] }
  0x81   :  { %v108_v41 = vsel %vm104_vm1, %v103_v37, %v97_v25  ;;  %v105_v42 = vsel %vm104_vm1, %v101_v38, %v103_v37  ;;  %v106_v43 = vsel %vm104_vm1, %v99_v24, %v101_v38  ;;  %v307_v38 = vrot.slane %v1452_v32, %v1770_v14 }
  0x82   :  { %v132_v44 = vmul.f32 %v115_v26, %v108_v41  ;;  %v134_v45 = vmul.f32 %v123_v29, %v106_v43  ;;  %652 = vmatprep.subr.bf16.mxu0 %v1576_v39  ;;  %v135_v47 = vmul.f32 %v127_v34, %v105_v42  ;;  %v319_v39 = vrot.slane %v1452_v32, %v1774_v18 }
  0x83   :  { %v311_v41 = vrot.slane %v1452_v32, %v1761_v11  ;;  %v315_v42 = vrot.slane %v1452_v32, %v1772_v15 }
  0x84   :  { %v157_v48 = vpop.permute.xlu1 %156  ;;  %v155_v49 = vpop.permute.xlu0 %154  ;;  %v1575_v50 = vpack.c.bf16 %v132_v44, %v74_v36  ;;  %v1578_v51 = vpack.c.bf16 %v135_v47, %v77_v46  ;;  %v1577_v52 = vpack.c.bf16 %v134_v45, %v76_v40 }
  0x85   :  { %v165_v59 = vsel %vm162_vm2, %v155_v49, %v157_v48 }
  0x86   :  { %653 = vmatpush1.bf16.msra.mxu0 %v1575_v50  ;;  %693 = vmatprep.subr.bf16.mxu1 %v1578_v51  ;;  %v191_v12 = vmul.f32 %v177_v57, %v165_v59 }
  0x87   :  { %694 = vmatpush1.bf16.msra.mxu1 %v1577_v52 }
  0x88   :  { %v161_v55 = vpop.permute.xlu1 %160  ;;  %v159_v56 = vpop.permute.xlu0 %158 }
  0x89   :  { %v166_v6 = vsel %vm162_vm2, %v161_v55, %v155_v49  ;;  %v164_v13 = vsel %vm162_vm2, %v157_v48, %v159_v56  ;;  %v163_v19 = vsel %vm162_vm2, %v159_v56, %v161_v55 }
  0x8a   :  { %v190_v20 = vmul.f32 %v173_v60, %v166_v6  ;;  %v192_v24 = vmul.f32 %v181_v61, %v164_v13  ;;  %v193_v28 = vmul.f32 %v185_v62, %v163_v19  ;;  %v1458_v60 = vld [vmem:[%s2138_s5 + $0x7] ss:$8 sm:$0xf]  ;;  %v1455_v61 = vld [vmem:[%s2138_s5 + $0x6] ss:$8 sm:$0xf] }
  0x8b   :  { %v377_v62 = vrot.slane %v1455_v61, %v1774_v18  ;;  %v1461_v13 = vld [vmem:[%s2138_s5 + $0x20] ss:$8 sm:$0xf]  ;;  %v427_v19 = vrot.slane %v1458_v60, %v1761_v11 }
  0x8c   :  { %v215_v63 = vpop.permute.xlu1 %214  ;;  %v213_v5 = vpop.permute.xlu0 %212 }
  0x8d   :  { %v223_v7 = vsel %vm220_vm3, %v213_v5, %v215_v63 }
  0x8e   :  { %v249_v16 = vmul.f32 %v235_v58, %v223_v7 }
  0x90   :  { %v219_v21 = vpop.permute.xlu1 %218  ;;  %v217_v22 = vpop.permute.xlu0 %216  ;;  %v1580_v23 = vpack.c.bf16 %v249_v16, %v191_v12  ;;  %v423_v12 = vrot.slane %v1458_v60, %v1770_v14 }
  0x91   :  { %v224_v25 = vsel %vm220_vm3, %v219_v21, %v213_v5  ;;  %v221_v26 = vsel %vm220_vm3, %v217_v22, %v219_v21  ;;  %v222_v27 = vsel %vm220_vm3, %v215_v63, %v217_v22  ;;  %v369_v63 = vrot.slane %v1455_v61, %v1761_v11 }
  0x92   :  { %v248_v29 = vmul.f32 %v231_v8, %v224_v25  ;;  %v250_v30 = vmul.f32 %v239_v9, %v222_v27  ;;  %v251_v31 = vmul.f32 %v243_v17, %v221_v26  ;;  %654 = vmatprep.subr.bf16.mxu0 %v1580_v23  ;;  %v373_v8 = vrot.slane %v1455_v61, %v1772_v15 }
  0x93   :  { %v435_v17 = vrot.slane %v1458_v60, %v1774_v18  ;;  %v365_v21 = vrot.slane %v1455_v61, %v1770_v14 }
  0x94   :  { %v291_v33 = vpop.permute.xlu1 %290  ;;  %v289_v34 = vpop.permute.xlu0 %288  ;;  %v1579_v35 = vpack.c.bf16 %v248_v29, %v190_v20  ;;  %v1582_v36 = vpack.c.bf16 %v251_v31, %v193_v28  ;;  %v1581_v37 = vpack.c.bf16 %v250_v30, %v192_v24  ;;  %v431_v20 = vrot.slane %v1458_v60, %v1772_v15 }
  0x95   :  { %v299_v40 = vsel %vm296_vm4, %v289_v34, %v291_v33  ;;  %v481_v28 = vrot.slane %v1461_v13, %v1770_v14 }
  0x96   :  { %655 = vmatpush1.bf16.msra.mxu0 %v1579_v35  ;;  %695 = vmatprep.subr.bf16.mxu1 %v1582_v36  ;;  %v324_v45 = vmul.f32 %v307_v38, %v299_v40 }
  0x97   :  { %696 = vmatpush1.bf16.msra.mxu1 %v1581_v37 }
  0x98   :  { %v295_v43 = vpop.permute.xlu1 %294  ;;  %v293_v44 = vpop.permute.xlu0 %292  ;;  %v1583_v57 = vpack.c.bf16 %v324_v45, %v1677_v1  ;;  %v493_v45 = vrot.slane %v1461_v13, %v1774_v18 }
  0x99   :  { %v300_v46 = vsel %vm296_vm4, %v295_v43, %v289_v34  ;;  %v297_v47 = vsel %vm296_vm4, %v293_v44, %v295_v43  ;;  %v298_v48 = vsel %vm296_vm4, %v291_v33, %v293_v44 }
  0x9a   :  { %v327_v49 = vmul.f32 %v319_v39, %v300_v46  ;;  %v325_v50 = vmul.f32 %v311_v41, %v298_v48  ;;  %v326_v51 = vmul.f32 %v315_v42, %v297_v47  ;;  %v485_v47 = vrot.slane %v1461_v13, %v1761_v11 }
  0x9b   :  { %v489_v48 = vrot.slane %v1461_v13, %v1772_v15 }
  0x9c   :  { %v349_v52 = vpop.permute.xlu1 %348  ;;  %v347_v53 = vpop.permute.xlu0 %346  ;;  %v1584_v54 = vpack.c.bf16 %v325_v50, %v1691_v3  ;;  %v1586_v55 = vpack.c.bf16 %v327_v49, %v1686_v2  ;;  %v1585_v56 = vpack.c.bf16 %v326_v51, %v1672_v0 }
  0x9d   :  { %v357_v23 = vsel %vm354_vm6, %v347_v53, %v349_v52 }
  0x9e   :  { %656 = vmatprep.subr.bf16.mxu0 %v1584_v54  ;;  %697 = vmatprep.subr.bf16.mxu1 %v1586_v55  ;;  %v382_v37 = vmul.f32 %v365_v21, %v357_v23 }
  0x9f   :  { %657 = vmatpush1.bf16.msra.mxu0 %v1583_v57  ;;  %698 = vmatpush1.bf16.msra.mxu1 %v1585_v56 }
  0xa0   :  { %v353_v58 = vpop.permute.xlu1 %352  ;;  %v351_v59 = vpop.permute.xlu0 %350 }
  0xa1   :  { %v358_v7 = vsel %vm354_vm6, %v353_v58, %v347_v53  ;;  %v356_v9 = vsel %vm354_vm6, %v349_v52, %v351_v59  ;;  %v355_v22 = vsel %vm354_vm6, %v351_v59, %v353_v58 }
  0xa2   :  { %v385_v24 = vmul.f32 %v377_v62, %v358_v7  ;;  %v383_v25 = vmul.f32 %v369_v63, %v356_v9  ;;  %v384_v33 = vmul.f32 %v373_v8, %v355_v22  ;;  %v520_v63 = vld [vmem:[%s2139_s1] sm:$0xf] }
  0xa4   :  { %v407_v5 = vpop.permute.xlu1 %406  ;;  %v405_v6 = vpop.permute.xlu0 %404 }
  0xa5   :  { %v415_v16 = vsel %vm412_vm5, %v405_v6, %v407_v5 }
  0xa6   :  { %v440_v29 = vmul.f32 %v423_v12, %v415_v16 }
  0xa8   :  { %v411_v26 = vpop.permute.xlu1 %410  ;;  %v409_v27 = vpop.permute.xlu0 %408  ;;  %v1587_v44 = vpack.c.bf16 %v440_v29, %v382_v37 }
  0xa9   :  { %v416_v30 = vsel %vm412_vm5, %v411_v26, %v405_v6  ;;  %v413_v31 = vsel %vm412_vm5, %v409_v27, %v411_v26  ;;  %v414_v32 = vsel %vm412_vm5, %v407_v5, %v409_v27  ;;  %v1223_v26 = vld [vmem:[%s2140_s4] sm:$0xff] }
  0xaa   :  { %v443_v34 = vmul.f32 %v435_v17, %v416_v30  ;;  %v441_v35 = vmul.f32 %v427_v19, %v414_v32  ;;  %v442_v36 = vmul.f32 %v431_v20, %v413_v31  ;;  %v750_v31 = vld [vmem:[%s2138_s5] ss:$8 sm:$0xf]  ;;  %v1490_v32 = vld [vmem:[%s2138_s5 + $0x1] ss:$8 sm:$0xf] }
  0xac   :  { %v465_v38 = vpop.permute.xlu1 %464  ;;  %v463_v39 = vpop.permute.xlu0 %462  ;;  %v1588_v40 = vpack.c.bf16 %v441_v35, %v383_v25  ;;  %v1590_v41 = vpack.c.bf16 %v443_v34, %v385_v24  ;;  %v1589_v42 = vpack.c.bf16 %v442_v36, %v384_v33  ;;  %v759_v35 = vrot.slane %v750_v31, %v1761_v11 }
  0xad   :  { %v473_v43 = vsel %vm470_vm7, %v463_v39, %v465_v38  ;;  %v815_v36 = vrot.slane %v1490_v32, %v1761_v11 }
  0xae   :  { %v498_v46 = vmul.f32 %v481_v28, %v473_v43  ;;  %658 = vmatprep.subr.bf16.mxu0 %v1588_v40  ;;  %699 = vmatprep.subr.bf16.mxu1 %v1590_v41  ;;  %v767_v41 = vrot.slane %v750_v31, %v1774_v18 }
  0xaf   :  { %659 = vmatpush1.bf16.msra.mxu0 %v1587_v44  ;;  %700 = vmatpush1.bf16.msra.mxu1 %v1589_v42  ;;  %v819_v42 = vrot.slane %v1490_v32, %v1772_v15  ;;  %v811_v44 = vrot.slane %v1490_v32, %v1770_v14 }
  0xb0   :  { %v469_v49 = vpop.permute.xlu1 %468  ;;  %v467_v50 = vpop.permute.xlu0 %466  ;;  %v1591_v54 = vpack.c.bf16 %v498_v46, %v498_v46 }
  0xb1   :  { %v474_v51 = vsel %vm470_vm7, %v469_v49, %v463_v39  ;;  %v471_v52 = vsel %vm470_vm7, %v467_v50, %v469_v49  ;;  %v472_v53 = vsel %vm470_vm7, %v465_v38, %v467_v50  ;;  %v755_v38 = vrot.slane %v750_v31, %v1770_v14 }
  0xb2   :  { %v501_v55 = vmul.f32 %v493_v45, %v474_v51  ;;  %v499_v56 = vmul.f32 %v485_v47, %v472_v53  ;;  %v500_v57 = vmul.f32 %v489_v48, %v471_v52  ;;  %v641_v61 = vsel %vm639_vm8, %v1591_v54, 0 }
  0xb3   :  { %v823_v48 = vrot.slane %v1490_v32, %v1774_v18  ;;  %v763_v49 = vrot.slane %v750_v31, %v1772_v15  ;;  %v1501_v32 = vld [vmem:[%s2138_s5 + $0x5] ss:$8 sm:$0xf] }
  0xb4   :  { %v1594_v58 = vpack.c.bf16 %v501_v55, %v501_v55  ;;  %v1592_v59 = vpack.c.bf16 %v499_v56, %v499_v56  ;;  %v1593_v60 = vpack.c.bf16 %v500_v57, %v500_v57 }
  0xb6   :  { %1484 = vmatprep.subr.msk.bf16.mxu0 %vm639_vm8, %v1592_v59  ;;  %1486 = vmatprep.subr.msk.bf16.mxu1 %vm639_vm8, %v1594_v58  ;;  %v647_v62 = vsel %vm639_vm8, %v1593_v60, 0 }
  0xb7   :  { %661 = vmatpush1.bf16.msra.mxu0 %v641_v61  ;;  %702 = vmatpush1.bf16.msra.mxu1 %v647_v62 }
  0xba   :  { %1485 = vmatmul.mubr.msk.bf16.vlgmr.msra.gmra.mrb[0].mxu0 %vm635_vm9, %v520_v63  ;;  %1487 = vmatmul.mubr.msk.bf16.vlgmr.msra.gmra.mrb[0].mxu1 %vm635_vm9, %v520_v63 }
  0xbb   :  { %1366 = vmatprep.mubr.bf16.mxu0 %v1632_v4  ;;  %1407 = vmatprep.mubr.bf16.mxu1 %v1632_v4 }
  0xc1   :  { %v543_v5 = vpop.permute.xlu0 %542 }
 0x18d   :  { %v686_v6 = vpop.f32.mrb[0].mxu0  ;;  %v727_v7 = vpop.f32.mrb[0].mxu1 }
 0x18e   :  { %v687_v8 = vadd.f32 %v686_v6, %v543_v5  ;;  %v728_v9 = vadd.f32 %v727_v7, %v543_v5  ;;  %v688_v12 = vpop.f32.mrb[1].mxu0  ;;  %v729_v13 = vpop.f32.mrb[1].mxu1 }
 0x18f   :  { %v690_v16 = vpop.f32.mrb[2].mxu0  ;;  %v731_v17 = vpop.f32.mrb[2].mxu1  ;;  %v689_v21 = vadd.f32 %v688_v12, %v543_v5  ;;  %v730_v24 = vadd.f32 %v729_v13, %v543_v5  ;;  %v1493_v12 = vld [vmem:[%s2138_s5 + $0x2] ss:$8 sm:$0xf] }
 0x190   :  { %v1912_v19 = vmax.f32 %v687_v8, 0.0  ;;  %v1914_v20 = vmax.f32 %v728_v9, 0.0  ;;  %v691_v22 = vpop.f32.mrb[3].mxu0  ;;  %v732_v23 = vpop.f32.mrb[3].mxu1 }
 0x191   :  { %v1920_v4 = vmax.f32 %v689_v21, 0.0  ;;  %v1926_v25 = vmax.f32 %v730_v24, 0.0  ;;  %v1496_v13 = vld [vmem:[%s2138_s5 + $0x3] ss:$8 sm:$0xf]  ;;  %v871_v21 = vrot.slane %v1493_v12, %v1761_v11  ;;  %v867_v24 = vrot.slane %v1493_v12, %v1770_v14 }
 0x192   :  { %742 = vrot.lane.b32.xlu0 %v1914_v20, %s1625_s25  ;;  %738 = vrot.lane.b32.xlu1 %v1912_v19, %s1625_s25  ;;  %v927_v22 = vrot.slane %v1496_v13, %v1761_v11  ;;  %v923_v31 = vrot.slane %v1496_v13, %v1770_v14 }
 0x196   :  { %794 = vrot.lane.b32.xlu0 %v1912_v19, %s1626_s30  ;;  %740 = vrot.lane.b32.xlu1 %v1920_v4, %s1625_s25 }
 0x19a   :  { %798 = vrot.lane.b32.xlu0 %v1914_v20, %s1626_s30  ;;  %744 = vrot.lane.b32.xlu1 %v1926_v25, %s1625_s25 }
 0x19e   :  { %850 = vrot.lane.b32.xlu0 %v1912_v19, %s1627_s0  ;;  %796 = vrot.lane.b32.xlu1 %v1920_v4, %s1626_s30 }
 0x1a2   :  { %854 = vrot.lane.b32.xlu0 %v1914_v20, %s1627_s0  ;;  %800 = vrot.lane.b32.xlu1 %v1926_v25, %s1626_s30 }
 0x1a6   :  { %906 = vrot.lane.b32.xlu0 %v1912_v19, %s1628_s7  ;;  %852 = vrot.lane.b32.xlu1 %v1920_v4, %s1627_s0 }
 0x1aa   :  { %910 = vrot.lane.b32.xlu0 %v1914_v20, %s1628_s7  ;;  %856 = vrot.lane.b32.xlu1 %v1926_v25, %s1627_s0 }
 0x1ae   :  { %980 = vrot.lane.b32.xlu0 %v1912_v19, %s1629_s8  ;;  %908 = vrot.lane.b32.xlu1 %v1920_v4, %s1628_s7 }
 0x1b2   :  { %984 = vrot.lane.b32.xlu0 %v1914_v20, %s1629_s8  ;;  %912 = vrot.lane.b32.xlu1 %v1926_v25, %s1628_s7 }
 0x1b6   :  { %1036 = vrot.lane.b32.xlu0 %v1912_v19, %s1630_s9  ;;  %982 = vrot.lane.b32.xlu1 %v1920_v4, %s1629_s8 }
 0x1ba   :  { %1040 = vrot.lane.b32.xlu0 %v1914_v20, %s1630_s9  ;;  %986 = vrot.lane.b32.xlu1 %v1926_v25, %s1629_s8 }
 0x1be   :  { %1092 = vrot.lane.b32.xlu0 %v1912_v19, %s1631_s10  ;;  %1038 = vrot.lane.b32.xlu1 %v1920_v4, %s1630_s9 }
 0x1c2   :  { %1096 = vrot.lane.b32.xlu0 %v1914_v20, %s1631_s10  ;;  %1042 = vrot.lane.b32.xlu1 %v1926_v25, %s1630_s9 }
 0x1c6   :  { %1148 = vrot.lane.b32.xlu0 %v1912_v19, %s1633_s11  ;;  %1094 = vrot.lane.b32.xlu1 %v1920_v4, %s1631_s10 }
 0x1ca   :  { %1152 = vrot.lane.b32.xlu0 %v1914_v20, %s1633_s11  ;;  %1098 = vrot.lane.b32.xlu1 %v1926_v25, %s1631_s10 }
 0x1ce   :  { %1226 = vperm.xlu0 %1624, %v1223_v26   ;;  %1150 = vrot.lane.b32.xlu1 %v1920_v4, %s1633_s11 }
 0x1d2   :  { %1154 = vrot.lane.b32.xlu1 %v1926_v25, %s1633_s11 }
 0x204   :  { %v743_v27 = vpop.permute.xlu0 %742  ;;  %v739_v28 = vpop.permute.xlu1 %738 }
 0x208   :  { %v795_v29 = vpop.permute.xlu0 %794  ;;  %v741_v30 = vpop.permute.xlu1 %740 }
 0x209   :  { %v748_v37 = vsel %vm47_vm0, %v739_v28, %v741_v30  ;;  %v747_v52 = vsel %vm47_vm0, %v741_v30, %v743_v27 }
 0x20a   :  { %v773_v45 = vmul.f32 %v759_v35, %v748_v37  ;;  %v774_v63 = vmul.f32 %v763_v49, %v747_v52  ;;  %v875_v37 = vrot.slane %v1493_v12, %v1772_v15  ;;  %v1001_v49 = vrot.slane %v1501_v32, %v1761_v11 }
 0x20c   :  { %v799_v33 = vpop.permute.xlu0 %798  ;;  %v745_v34 = vpop.permute.xlu1 %744 }
 0x20d   :  { %v746_v50 = vsel %vm47_vm0, %v743_v27, %v745_v34  ;;  %v749_v51 = vsel %vm47_vm0, %v745_v34, %v739_v28  ;;  %v879_v28 = vrot.slane %v1493_v12, %v1774_v18 }
 0x20e   :  { %v772_v59 = vmul.f32 %v755_v38, %v749_v51  ;;  %v775_v60 = vmul.f32 %v767_v41, %v746_v50 }
 0x210   :  { %v851_v39 = vpop.permute.xlu0 %850  ;;  %v797_v40 = vpop.permute.xlu1 %796 }
 0x211   :  { %v804_v43 = vsel %vm104_vm1, %v795_v29, %v797_v40  ;;  %v803_v46 = vsel %vm104_vm1, %v797_v40, %v799_v33 }
 0x212   :  { %v829_v47 = vmul.f32 %v815_v36, %v804_v43  ;;  %v830_v56 = vmul.f32 %v819_v42, %v803_v46  ;;  %v935_v36 = vrot.slane %v1496_v13, %v1774_v18 }
 0x214   :  { %v855_v53 = vpop.permute.xlu0 %854  ;;  %v801_v54 = vpop.permute.xlu1 %800  ;;  %v1596_v55 = vpack.c.bf16 %v829_v47, %v773_v45  ;;  %v1597_v9 = vpack.c.bf16 %v830_v56, %v774_v63  ;;  %v997_v45 = vrot.slane %v1501_v32, %v1770_v14 }
 0x215   :  { %v802_v57 = vsel %vm104_vm1, %v799_v33, %v801_v54  ;;  %v805_v58 = vsel %vm104_vm1, %v801_v54, %v795_v29  ;;  %v931_v29 = vrot.slane %v1496_v13, %v1772_v15 }
 0x216   :  { %v828_v61 = vmul.f32 %v811_v44, %v805_v58  ;;  %v831_v62 = vmul.f32 %v823_v48, %v802_v57  ;;  %1334 = vmatprep.subr.bf16.mxu0 %v1596_v55 }
 0x218   :  { %v1595_v5 = vpack.c.bf16 %v828_v61, %v772_v59  ;;  %v907_v6 = vpop.permute.xlu0 %906  ;;  %v853_v7 = vpop.permute.xlu1 %852  ;;  %v1598_v8 = vpack.c.bf16 %v831_v62, %v775_v60  ;;  %v1005_v61 = vrot.slane %v1501_v32, %v1772_v15 }
 0x219   :  { %v860_v23 = vsel %vm162_vm2, %v851_v39, %v853_v7  ;;  %v859_v41 = vsel %vm162_vm2, %v853_v7, %v855_v53 }
 0x21a   :  { %1335 = vmatpush1.bf16.msra.mxu0 %v1595_v5  ;;  %1375 = vmatprep.subr.bf16.mxu1 %v1598_v8  ;;  %v885_v33 = vmul.f32 %v871_v21, %v860_v23  ;;  %v1009_v5 = vrot.slane %v1501_v32, %v1774_v18 }
 0x21b   :  { %1376 = vmatpush1.bf16.msra.mxu1 %v1597_v9 }
 0x21c   :  { %v911_v16 = vpop.permute.xlu0 %910  ;;  %v857_v17 = vpop.permute.xlu1 %856 }
 0x21d   :  { %v858_v38 = vsel %vm162_vm2, %v855_v53, %v857_v17  ;;  %v861_v40 = vsel %vm162_vm2, %v857_v17, %v851_v39  ;;  %v886_v53 = vmul.f32 %v875_v37, %v859_v41 }
 0x21e   :  { %v884_v50 = vmul.f32 %v867_v24, %v861_v40  ;;  %v887_v51 = vmul.f32 %v879_v28, %v858_v38  ;;  %v1507_v24 = vld [vmem:[%s2138_s5 + $0x7] ss:$8 sm:$0xf] }
 0x21f   :  { %v1117_v37 = vrot.slane %v1507_v24, %v1772_v15  ;;  %v1121_v38 = vrot.slane %v1507_v24, %v1774_v18 }
 0x220   :  { %v981_v26 = vpop.permute.xlu0 %980  ;;  %v909_v27 = vpop.permute.xlu1 %908 }
 0x221   :  { %v916_v30 = vsel %vm220_vm3, %v907_v6, %v909_v27  ;;  %v915_v34 = vsel %vm220_vm3, %v909_v27, %v911_v16 }
 0x222   :  { %v941_v35 = vmul.f32 %v927_v22, %v916_v30  ;;  %v942_v46 = vmul.f32 %v931_v29, %v915_v34  ;;  %v1109_v29 = vrot.slane %v1507_v24, %v1770_v14 }
 0x224   :  { %v985_v42 = vpop.permute.xlu0 %984  ;;  %v913_v43 = vpop.permute.xlu1 %912  ;;  %v1600_v44 = vpack.c.bf16 %v941_v35, %v885_v33  ;;  %v1601_v58 = vpack.c.bf16 %v942_v46, %v886_v53 }
 0x225   :  { %v914_v47 = vsel %vm220_vm3, %v911_v16, %v913_v43  ;;  %v917_v48 = vsel %vm220_vm3, %v913_v43, %v907_v6 }
 0x226   :  { %v940_v39 = vmul.f32 %v923_v31, %v917_v48  ;;  %v943_v52 = vmul.f32 %v935_v36, %v914_v47  ;;  %1336 = vmatprep.subr.bf16.mxu0 %v1600_v44 }
 0x228   :  { %v1599_v54 = vpack.c.bf16 %v940_v39, %v884_v50  ;;  %v1037_v55 = vpop.permute.xlu0 %1036  ;;  %v983_v56 = vpop.permute.xlu1 %982  ;;  %v1602_v57 = vpack.c.bf16 %v943_v52, %v887_v51 }
 0x229   :  { %v989_v59 = vsel %vm296_vm4, %v983_v56, %v985_v42  ;;  %v990_v60 = vsel %vm296_vm4, %v981_v26, %v983_v56 }
 0x22a   :  { %v1014_v62 = vmul.f32 %v997_v45, %v990_v60  ;;  %v1015_v63 = vmul.f32 %v1001_v49, %v989_v59  ;;  %1337 = vmatpush1.bf16.msra.mxu0 %v1599_v54  ;;  %1377 = vmatprep.subr.bf16.mxu1 %v1602_v57  ;;  %v1510_v45 = vld [vmem:[%s2138_s5 + $0x20] ss:$8 sm:$0xf] }
 0x22b   :  { %1378 = vmatpush1.bf16.msra.mxu1 %v1601_v58  ;;  %v1165_v52 = vrot.slane %v1510_v45, %v1770_v14  ;;  %v1169_v53 = vrot.slane %v1510_v45, %v1761_v11 }
 0x22c   :  { %v1603_v6 = vpack.c.bf16 %v1014_v62, %v1912_v19  ;;  %v1041_v7 = vpop.permute.xlu0 %1040  ;;  %v987_v8 = vpop.permute.xlu1 %986  ;;  %v1604_v9 = vpack.c.bf16 %v1015_v63, %v1920_v4  ;;  %v1504_v4 = vld [vmem:[%s2138_s5 + $0x6] ss:$8 sm:$0xf] }
 0x22d   :  { %v988_v12 = vsel %vm296_vm4, %v985_v42, %v987_v8  ;;  %v991_v13 = vsel %vm296_vm4, %v987_v8, %v981_v26  ;;  %v1053_v28 = vrot.slane %v1504_v4, %v1770_v14  ;;  %v1061_v32 = vrot.slane %v1504_v4, %v1772_v15 }
 0x22e   :  { %v1016_v16 = vmul.f32 %v1005_v61, %v988_v12  ;;  %v1017_v17 = vmul.f32 %v1009_v5, %v991_v13  ;;  %1338 = vmatprep.subr.bf16.mxu0 %v1604_v9  ;;  %v1065_v33 = vrot.slane %v1504_v4, %v1774_v18 }
 0x22f   :  { %1339 = vmatpush1.bf16.msra.mxu0 %v1603_v6  ;;  %v1177_v6 = vrot.slane %v1510_v45, %v1774_v18 }
 0x230   :  { %v1605_v21 = vpack.c.bf16 %v1016_v16, %v1914_v20  ;;  %v1093_v22 = vpop.permute.xlu0 %1092  ;;  %v1039_v23 = vpop.permute.xlu1 %1038  ;;  %v1606_v19 = vpack.c.bf16 %v1017_v17, %v1926_v25  ;;  %v1057_v20 = vrot.slane %v1504_v4, %v1761_v11  ;;  %v1113_v25 = vrot.slane %v1507_v24, %v1761_v11 }
 0x231   :  { %v1045_v30 = vsel %vm354_vm6, %v1039_v23, %v1041_v7  ;;  %v1046_v31 = vsel %vm354_vm6, %v1037_v55, %v1039_v23  ;;  %v1173_v11 = vrot.slane %v1510_v45, %v1772_v15  ;;  %v1204_v15 = vld [vmem:[%s2141_s3] sm:$0xf] }
 0x232   :  { %1379 = vmatprep.subr.bf16.mxu1 %v1606_v19  ;;  %v1070_v40 = vmul.f32 %v1053_v28, %v1046_v31  ;;  %v1071_v41 = vmul.f32 %v1057_v20, %v1045_v30 }
 0x233   :  { %1380 = vmatpush1.bf16.msra.mxu1 %v1605_v21 }
 0x234   :  { %v1097_v26 = vpop.permute.xlu0 %1096  ;;  %v1043_v27 = vpop.permute.xlu1 %1042 }
 0x235   :  { %v1044_v46 = vsel %vm354_vm6, %v1041_v7, %v1043_v27  ;;  %v1047_v47 = vsel %vm354_vm6, %v1043_v27, %v1037_v55 }
 0x236   :  { %v1072_v54 = vmul.f32 %v1061_v32, %v1044_v46  ;;  %v1073_v56 = vmul.f32 %v1065_v33, %v1047_v47 }
 0x238   :  { %v1095_v34 = vpop.permute.xlu1 %1094  ;;  %v1149_v42 = vpop.permute.xlu0 %1148 }
 0x239   :  { %v1101_v35 = vsel %vm412_vm5, %v1095_v34, %v1097_v26  ;;  %v1102_v36 = vsel %vm412_vm5, %v1093_v22, %v1095_v34 }
 0x23a   :  { %v1126_v43 = vmul.f32 %v1109_v29, %v1102_v36  ;;  %v1127_v44 = vmul.f32 %v1113_v25, %v1101_v35 }
 0x23c   :  { %v1607_v48 = vpack.c.bf16 %v1126_v43, %v1070_v40  ;;  %v1099_v49 = vpop.permute.xlu1 %1098  ;;  %v1608_v50 = vpack.c.bf16 %v1127_v44, %v1071_v41  ;;  %v1153_v55 = vpop.permute.xlu0 %1152 }
 0x23d   :  { %v1100_v51 = vsel %vm412_vm5, %v1097_v26, %v1099_v49  ;;  %v1103_v39 = vsel %vm412_vm5, %v1099_v49, %v1093_v22 }
 0x23e   :  { %v1128_v57 = vmul.f32 %v1117_v37, %v1100_v51  ;;  %v1129_v58 = vmul.f32 %v1121_v38, %v1103_v39  ;;  %1340 = vmatprep.subr.bf16.mxu0 %v1608_v50 }
 0x23f   :  { %1341 = vmatpush1.bf16.msra.mxu0 %v1607_v48 }
 0x240   :  { %v1609_v59 = vpack.c.bf16 %v1128_v57, %v1072_v54  ;;  %v1151_v60 = vpop.permute.xlu1 %1150  ;;  %v1610_v61 = vpack.c.bf16 %v1129_v58, %v1073_v56 }
 0x241   :  { %v1157_v62 = vsel %vm470_vm7, %v1151_v60, %v1153_v55  ;;  %v1158_v63 = vsel %vm470_vm7, %v1149_v42, %v1151_v60 }
 0x242   :  { %v1182_v5 = vmul.f32 %v1165_v52, %v1158_v63  ;;  %v1183_v14 = vmul.f32 %v1169_v53, %v1157_v62  ;;  %1381 = vmatprep.subr.bf16.mxu1 %v1610_v61 }
 0x243   :  { %1382 = vmatpush1.bf16.msra.mxu1 %v1609_v59 }
 0x244   :  { %v1611_v7 = vpack.c.bf16 %v1182_v5, %v1182_v5  ;;  %v1612_v8 = vpack.c.bf16 %v1183_v14, %v1183_v14  ;;  %v1155_v9 = vpop.permute.xlu1 %1154 }
 0x245   :  { %v1156_v12 = vsel %vm470_vm7, %v1153_v55, %v1155_v9  ;;  %v1159_v13 = vsel %vm470_vm7, %v1155_v9, %v1149_v42 }
 0x246   :  { %v1184_v16 = vmul.f32 %v1173_v11, %v1156_v12  ;;  %v1185_v17 = vmul.f32 %v1177_v6, %v1159_v13  ;;  %1533 = vmatprep.subr.msk.bf16.mxu0 %vm639_vm8, %v1612_v8  ;;  %v1323_v21 = vsel %vm639_vm8, %v1611_v7, 0 }
 0x247   :  { %1343 = vmatpush1.bf16.msra.mxu0 %v1323_v21 }
 0x248   :  { %v1613_v18 = vpack.c.bf16 %v1184_v16, %v1184_v16  ;;  %v1614_v22 = vpack.c.bf16 %v1185_v17, %v1185_v17 }
 0x24a   :  { %1534 = vmatmul.mubr.msk.bf16.vlgmr.msra.gmra.mrb[4].mxu0 %vm635_vm9, %v1204_v15  ;;  %1535 = vmatprep.subr.msk.bf16.mxu1 %vm639_vm8, %v1614_v22  ;;  %v1329_v10 = vsel %vm639_vm8, %v1613_v18, 0 }
 0x24b   :  { %1384 = vmatpush1.bf16.msra.mxu1 %v1329_v10 }
 0x24d   :  { %v1227_v23 = vpop.permute.xlu0 %1226 }
 0x24e   :  { %1536 = vmatmul.mubr.msk.bf16.vlgmr.msra.gmra.mrb[4].mxu1 %vm635_vm9, %v1204_v15 }
 0x31d   :  { %v1368_v19 = vpop.f32.mrb[4].mxu0 }
 0x31e   :  { %v1369_v4 = vadd.f32 %v1368_v19, %v1227_v23  ;;  %v1370_v24 = vpop.f32.mrb[5].mxu0 }
 0x31f   :  { %v1371_v26 = vadd.f32 %v1370_v24, %v1227_v23  ;;  %v1372_v27 = vpop.f32.mrb[6].mxu0 }
 0x320   :  { %v1416_v28 = vmax.f32 %v1369_v4, 0.0  ;;  %v1373_v20 = vpop.f32.mrb[7].mxu0 }
 0x321   :  { %v1417_v29 = vmax.f32 %v1371_v26, 0.0  ;;  %v1409_v25 = vpop.f32.mrb[4].mxu1 }
 0x322   :  { %v1420_v30 = vadd.f32 %v1416_v28, %v1677_v1  ;;  %v1410_v31 = vadd.f32 %v1409_v25, %v1227_v23  ;;  %v1411_v32 = vpop.f32.mrb[5].mxu1 }
 0x323   :  { %v1421_v33 = vadd.f32 %v1417_v29, %v1691_v3  ;;  %v1412_v34 = vadd.f32 %v1411_v32, %v1227_v23  ;;  %v1413_v35 = vpop.f32.mrb[6].mxu1 }
 0x324   :  { %v1424_v36 = vmax.f32 %v1420_v30, 0.0  ;;  %v1418_v37 = vmax.f32 %v1410_v31, 0.0  ;;  %v1414_v38 = vpop.f32.mrb[7].mxu1 }
 0x325   :  { %v1425_v40 = vmax.f32 %v1421_v33, 0.0  ;;  %v1419_v41 = vmax.f32 %v1412_v34, 0.0 }
 0x326   :  { %1428 = vst [vmem:[%s2142_s6] sm:$0xff] %v1424_v36  ;;  %v1422_v42 = vadd.f32 %v1672_v0, %v1418_v37 }
 0x327   :  { %1429 = vst [vmem:[%s2142_s6 + $0x8] sm:$0xff] %v1425_v40  ;;  %v1423_v1 = vadd.f32 %v1686_v2, %v1419_v41 }
 0x328   :  { %v1426_v3 = vmax.f32 %v1422_v42, 0.0 }
 0x329   :  { %v1427_v43 = vmax.f32 %v1423_v1, 0.0 }
 0x32a   :  { %1537 = vst [vmem:[%s2142_s6 + $0x10] sm:$0xff] %v1426_v3 }
 0x32b   :  { %1538 = vst [vmem:[%s2142_s6 + $0x18] sm:$0xff] %v1427_v43 }

</bundles_post_ra>
